<compile_context>
chip_gen: v7x
topology: tpu7x:2x2x1
jax: 0.10.0
libtpu: 0.0.40
codegen_flags: <defaults>
</compile_context>

<pallas_src>
import functools
import math

import jax
import jax.numpy as jnp
from jax.experimental import pallas as pl
from jax.experimental.pallas import tpu as pltpu


def _critic_kernel(s_ref, a_ref, w1s_ref, w1a_ref, w25_ref, w36_ref, b_ref,
                   out_ref, *, h0, h1):
    # Activations enter f32, are cast to bf16 only for the MXU ops.
    s = s_ref[...].astype(jnp.bfloat16)           # (B, state_dim)
    a = a_ref[...].astype(jnp.bfloat16)           # (B, action_dim)

    # Fused bias vector layout: [b1|b4 | b2 | b5 | b3|b6]  (all f32).
    b14 = b_ref[:, 0:2 * h0]
    b2 = b_ref[:, 2 * h0:2 * h0 + h1]
    b5 = b_ref[:, 2 * h0 + h1:2 * h0 + 2 * h1]
    b36 = b_ref[:, 2 * h0 + 2 * h1:]

    # --- fused layer 1|4 : x @ [W1^T | W4^T], concat fused via split weights ---
    h = (jnp.dot(s, w1s_ref[...], preferred_element_type=jnp.float32)
         + jnp.dot(a, w1a_ref[...], preferred_element_type=jnp.float32)
         + b14)                                    # (B, 2*h0), f32
    h = jnp.maximum(h, 0.0).astype(jnp.bfloat16)

    # --- layer 2 / layer 5 (independent matmuls, stacked weights) ---
    g1 = jnp.dot(h[:, :h0], w25_ref[0], preferred_element_type=jnp.float32) + b2
    g2 = jnp.dot(h[:, h0:], w25_ref[1], preferred_element_type=jnp.float32) + b5
    g = jnp.concatenate(
        [jnp.maximum(g1, 0.0), jnp.maximum(g2, 0.0)], axis=-1
    ).astype(jnp.bfloat16)                         # (B, 2*h1)

    # --- fused layer 3|6 via block-diagonal (2*h1, 2) weights ---
    q = jnp.dot(g, w36_ref[...], preferred_element_type=jnp.float32) + b36
    out_ref[...] = q.astype(out_ref.dtype)         # (B, 2): lane 0 = q1, lane 1 = q2


def prepare_critic_params(params, state_dim, weight_dtype=jnp.bfloat16):
    """One-time packing: transpose, fuse heads, cast weights to bf16.

    Call this ONCE (outside the jitted training step) and pass the result to
    critic_forward.
    """
    h0 = params["l1_w"].shape[0]
    h1 = params["l2_w"].shape[0]

    # Layer 1|4 fused: (K, 2*h0), then split by input (state rows / action rows).
    w14 = jnp.concatenate([params["l1_w"].T, params["l4_w"].T], axis=1)
    # Layer 2/5 stacked: (2, h0, h1).
    w25 = jnp.stack([params["l2_w"].T, params["l5_w"].T], axis=0)
    # Layer 3|6 block-diagonal: (2*h1, 2).
    z = jnp.zeros((h1, 1), params["l3_w"].dtype)
    w36 = jnp.concatenate(
        [jnp.concatenate([params["l3_w"].T, z], axis=1),
         jnp.concatenate([z, params["l6_w"].T], axis=1)], axis=0)
    # All biases fused into one f32 row: [b1|b4 | b2 | b5 | b3|b6].
    b = jnp.concatenate(
        [params["l1_b"], params["l4_b"],
         params["l2_b"], params["l5_b"],
         params["l3_b"], params["l6_b"]]).reshape(1, -1).astype(jnp.float32)

    return {
        "w1s": w14[:state_dim].astype(weight_dtype),   # (state_dim, 2*h0)
        "w1a": w14[state_dim:].astype(weight_dtype),   # (action_dim, 2*h0)
        "w25": w25.astype(weight_dtype),               # (2, h0, h1)
        "w36": w36.astype(weight_dtype),               # (2*h1, 2)
        "b": b,                                        # (1, 2*h0 + 2*h1 + 2)
    }


def critic_forward(state, action, packed):
    """Twin-Q forward pass. Returns (q1, q2), each of shape (batch,)."""
    B = state.shape[0]
    h0 = packed["w25"].shape[1]
    h1 = packed["w25"].shape[2]
    sd = state.shape[1]
    ad = action.shape[1]

    inputs = (state.astype(jnp.float32), action.astype(jnp.float32),
              packed["w1s"], packed["w1a"], packed["w25"], packed["w36"],
              packed["b"])

    vmem = pl.BlockSpec(memory_space=pltpu.MemorySpace.VMEM)

    flops = 2 * B * ((sd + ad) * 2 * h0 + 2 * h0 * h1 + 2 * h1 * 2)
    bytes_accessed = sum(int(x.size) * x.dtype.itemsize for x in inputs) + B * 2 * 4

    q = pl.pallas_call(
        functools.partial(_critic_kernel, h0=h0, h1=h1),
        out_shape=jax.ShapeDtypeStruct((B, 2), jnp.float32),
        in_specs=[vmem] * len(inputs),
        out_specs=vmem,
        compiler_params=pltpu.CompilerParams(vmem_limit_bytes=4 * 1024 * 1024),
        cost_estimate=pl.CostEstimate(
            flops=flops, transcendentals=0, bytes_accessed=bytes_accessed),
    )(*inputs)

    # torch.squeeze(q, dim=-1) for each head.
    return q[:, 0], q[:, 1]


def init_critic_params(key, state_dim, action_dim, hidden_dim=(256, 256)):
    """Deterministic PyTorch-style (Kaiming-uniform-ish) Linear init, torch layout."""
    dims = {
        "l1": (hidden_dim[0], state_dim + action_dim),
        "l2": (hidden_dim[1], hidden_dim[0]),
        "l3": (1, hidden_dim[1]),
        "l4": (hidden_dim[0], state_dim + action_dim),
        "l5": (hidden_dim[1], hidden_dim[0]),
        "l6": (1, hidden_dim[1]),
    }
    params = {}
    for name, (out_f, in_f) in dims.items():
        key, kw, kb = jax.random.split(key, 3)
        bound = 1.0 / math.sqrt(in_f)
        params[name + "_w"] = jax.random.uniform(
            kw, (out_f, in_f), jnp.float32, minval=-bound, maxval=bound)
        params[name + "_b"] = jax.random.uniform(
            kb, (out_f,), jnp.float32, minval=-bound, maxval=bound)
    return params


def critic_forward_ref(state, action, params):
    """Pure-JAX f32 reference (matches the original PyTorch module)."""
    x = jnp.concatenate([state, action], axis=-1)

    def head(l_a, l_b, l_c):
        h = jax.nn.relu(x @ params[l_a + "_w"].T + params[l_a + "_b"])
        h = jax.nn.relu(h @ params[l_b + "_w"].T + params[l_b + "_b"])
        q = h @ params[l_c + "_w"].T + params[l_c + "_b"]
        return jnp.squeeze(q, axis=-1)

    return head("l1", "l2", "l3"), head("l4", "l5", "l6")


if __name__ == "__main__":
    batch = 8
    state_dim = 16
    action_dim = 8
    hidden_dim = (256, 256)

    key = jax.random.PRNGKey(0)
    k_params, k_state, k_action = jax.random.split(key, 3)

    params = init_critic_params(k_params, state_dim, action_dim, hidden_dim)
    packed = prepare_critic_params(params, state_dim)   # one-time, outside the jit

    state = jax.random.normal(k_state, (batch, state_dim), jnp.float32)
    action = jax.random.normal(k_action, (batch, action_dim), jnp.float32)

    q1, q2 = jax.jit(critic_forward)(state, action, packed)
    jax.block_until_ready((q1, q2))

    q1_ref, q2_ref = critic_forward_ref(state, action, params)
    assert q1.shape == (batch,) and q2.shape == (batch,)
    # bf16 weights -> loosened tolerance vs the f32 reference (per review).
    assert jnp.allclose(q1, q1_ref, atol=2e-2, rtol=2e-2), (q1, q1_ref)
    assert jnp.allclose(q2, q2_ref, atol=2e-2, rtol=2e-2), (q2, q2_ref)

    print("KERNEL_OK")
</pallas_src>

<mosaic_0001>
module attributes {stable_mosaic.version = 11 : i64} {
  func.func @_critic_kernel(%arg0: memref<8x16xf32, #tpu.memory_space<vmem>>, %arg1: memref<8x8xf32, #tpu.memory_space<vmem>>, %arg2: memref<16x512xbf16, #tpu.memory_space<vmem>>, %arg3: memref<8x512xbf16, #tpu.memory_space<vmem>>, %arg4: memref<2x256x256xbf16, #tpu.memory_space<vmem>>, %arg5: memref<512x2xbf16, #tpu.memory_space<vmem>>, %arg6: memref<1x1026xf32, #tpu.memory_space<vmem>>, %arg7: memref<8x2xf32, #tpu.memory_space<vmem>>) attributes {dimension_semantics = [], scalar_prefetch = 0 : i64, scratch_operands = 0 : i64, tpu.core_type = #tpu.core_type<tc>} {
    %c0 = arith.constant 0 : index
    %c0_0 = arith.constant 0 : index
    %0 = vector.load %arg0[%c0, %c0_0] : memref<8x16xf32, #tpu.memory_space<vmem>>, vector<8x16xf32>
    %1 = arith.truncf %0 : vector<8x16xf32> to vector<8x16xbf16>
    %c0_1 = arith.constant 0 : index
    %c0_2 = arith.constant 0 : index
    %2 = vector.load %arg1[%c0_1, %c0_2] : memref<8x8xf32, #tpu.memory_space<vmem>>, vector<8x8xf32>
    %3 = arith.truncf %2 : vector<8x8xf32> to vector<8x8xbf16>
    %c0_3 = arith.constant 0 : index
    %c0_4 = arith.constant 0 : index
    %4 = vector.load %arg6[%c0_3, %c0_4] : memref<1x1026xf32, #tpu.memory_space<vmem>>, vector<1x512xf32>
    %c0_5 = arith.constant 0 : index
    %c512 = arith.constant 512 : index
    %5 = vector.load %arg6[%c0_5, %c512] : memref<1x1026xf32, #tpu.memory_space<vmem>>, vector<1x256xf32>
    %c0_6 = arith.constant 0 : index
    %c768 = arith.constant 768 : index
    %6 = vector.load %arg6[%c0_6, %c768] : memref<1x1026xf32, #tpu.memory_space<vmem>>, vector<1x256xf32>
    %c0_7 = arith.constant 0 : index
    %c1024 = arith.constant 1024 : index
    %7 = vector.load %arg6[%c0_7, %c1024] : memref<1x1026xf32, #tpu.memory_space<vmem>>, vector<1x2xf32>
    %c0_8 = arith.constant 0 : index
    %c0_9 = arith.constant 0 : index
    %8 = vector.load %arg2[%c0_8, %c0_9] : memref<16x512xbf16, #tpu.memory_space<vmem>>, vector<16x512xbf16>
    %cst = arith.constant dense<0.000000e+00> : vector<8x512xf32>
    %9 = tpu.matmul %1, %8, %cst {dimension_numbers = #tpu.dot_dimension_numbers<[1], [0], [0], [1], [0, 0, 1, 1], [], []>} : vector<8x16xbf16>, vector<16x512xbf16>, vector<8x512xf32> -> vector<8x512xf32>
    %c0_10 = arith.constant 0 : index
    %c0_11 = arith.constant 0 : index
    %10 = vector.load %arg3[%c0_10, %c0_11] : memref<8x512xbf16, #tpu.memory_space<vmem>>, vector<8x512xbf16>
    %cst_12 = arith.constant dense<0.000000e+00> : vector<8x512xf32>
    %11 = tpu.matmul %3, %10, %cst_12 {dimension_numbers = #tpu.dot_dimension_numbers<[1], [0], [0], [1], [0, 0, 1, 1], [], []>} : vector<8x8xbf16>, vector<8x512xbf16>, vector<8x512xf32> -> vector<8x512xf32>
    %12 = arith.addf %9, %11 : vector<8x512xf32>
    %13 = vector.broadcast %4 : vector<1x512xf32> to vector<8x512xf32>
    %14 = arith.addf %12, %13 : vector<8x512xf32>
    %cst_13 = arith.constant 0.000000e+00 : f32
    %15 = vector.broadcast %cst_13 : f32 to vector<8x512xf32>
    %16 = arith.maximumf %14, %15 : vector<8x512xf32>
    %17 = arith.truncf %16 : vector<8x512xf32> to vector<8x512xbf16>
    %18 = vector.extract_strided_slice %17 {offsets = [0, 0], sizes = [8, 256], strides = [1, 1]} : vector<8x512xbf16> to vector<8x256xbf16>
    %c0_14 = arith.constant 0 : index
    %c0_15 = arith.constant 0 : index
    %c0_16 = arith.constant 0 : index
    %19 = vector.load %arg4[%c0_14, %c0_15, %c0_16] : memref<2x256x256xbf16, #tpu.memory_space<vmem>>, vector<1x256x256xbf16>
    %20 = vector.shape_cast %19 : vector<1x256x256xbf16> to vector<256x256xbf16>
    %cst_17 = arith.constant dense<0.000000e+00> : vector<8x256xf32>
    %21 = tpu.matmul %18, %20, %cst_17 {dimension_numbers = #tpu.dot_dimension_numbers<[1], [0], [0], [1], [0, 0, 1, 1], [], []>} : vector<8x256xbf16>, vector<256x256xbf16>, vector<8x256xf32> -> vector<8x256xf32>
    %22 = vector.broadcast %5 : vector<1x256xf32> to vector<8x256xf32>
    %23 = arith.addf %21, %22 : vector<8x256xf32>
    %24 = vector.extract_strided_slice %17 {offsets = [0, 256], sizes = [8, 256], strides = [1, 1]} : vector<8x512xbf16> to vector<8x256xbf16>
    %c1 = arith.constant 1 : index
    %c0_18 = arith.constant 0 : index
    %c0_19 = arith.constant 0 : index
    %25 = vector.load %arg4[%c1, %c0_18, %c0_19] : memref<2x256x256xbf16, #tpu.memory_space<vmem>>, vector<1x256x256xbf16>
    %26 = vector.shape_cast %25 : vector<1x256x256xbf16> to vector<256x256xbf16>
    %cst_20 = arith.constant dense<0.000000e+00> : vector<8x256xf32>
    %27 = tpu.matmul %24, %26, %cst_20 {dimension_numbers = #tpu.dot_dimension_numbers<[1], [0], [0], [1], [0, 0, 1, 1], [], []>} : vector<8x256xbf16>, vector<256x256xbf16>, vector<8x256xf32> -> vector<8x256xf32>
    %28 = vector.broadcast %6 : vector<1x256xf32> to vector<8x256xf32>
    %29 = arith.addf %27, %28 : vector<8x256xf32>
    %cst_21 = arith.constant 0.000000e+00 : f32
    %30 = vector.broadcast %cst_21 : f32 to vector<8x256xf32>
    %31 = arith.maximumf %23, %30 : vector<8x256xf32>
    %cst_22 = arith.constant 0.000000e+00 : f32
    %32 = vector.broadcast %cst_22 : f32 to vector<8x256xf32>
    %33 = arith.maximumf %29, %32 : vector<8x256xf32>
    %34 = tpu.concatenate %31, %33 in 1 : vector<8x256xf32>, vector<8x256xf32> -> vector<8x512xf32>
    %35 = arith.truncf %34 : vector<8x512xf32> to vector<8x512xbf16>
    %c0_23 = arith.constant 0 : index
    %c0_24 = arith.constant 0 : index
    %36 = vector.load %arg5[%c0_23, %c0_24] : memref<512x2xbf16, #tpu.memory_space<vmem>>, vector<512x2xbf16>
    %cst_25 = arith.constant dense<0.000000e+00> : vector<8x2xf32>
    %37 = tpu.matmul %35, %36, %cst_25 {dimension_numbers = #tpu.dot_dimension_numbers<[1], [0], [0], [1], [0, 0, 1, 1], [], []>} : vector<8x512xbf16>, vector<512x2xbf16>, vector<8x2xf32> -> vector<8x2xf32>
    %38 = vector.broadcast %7 : vector<1x2xf32> to vector<8x2xf32>
    %39 = arith.addf %37, %38 : vector<8x2xf32>
    %c0_26 = arith.constant 0 : index
    %c0_27 = arith.constant 0 : index
    %40 = vector.load %arg7[%c0_26, %c0_27] : memref<8x2xf32, #tpu.memory_space<vmem>>, vector<8x2xf32>
    tpu.vector_store %arg7[%c0_26, %c0_27], %39 {strides = array<i32>} : memref<8x2xf32, #tpu.memory_space<vmem>>, vector<8x2xf32>,
    return
  }
}

</mosaic_0001>

<bundles_post_ra>
// kernel: critic_forward.1
= control target key start
LH: loop header
LB: loop body
LE: loop exit
PB: predicated region body
PF: predicated region fallthrough
CT: control target
= control target key end

     0   :  { %12 = vsyncpa [#allocation3], 0  ;;  %s1470_s24 = smov [#allocation2]   ;;  %s1671_s0 = inlined_call_operand.vmem [shape: f32[8,16], index: 0, kind: input, shape index: {}]   ;;  %s1672_s1 = inlined_call_operand.vmem [shape: f32[8,8], index: 1, kind: input, shape index: {}]   ;;  %s1673_s2 = inlined_call_operand.vmem [shape: bf16[16,512], index: 2, kind: input, shape index: {}]   ;;  %s1674_s3 = inlined_call_operand.vmem [shape: bf16[8,512], index: 3, kind: input, shape index: {}]   ;;  %s1675_s4 = inlined_call_operand.hbm [shape: bf16[2,256,256], index: 4, kind: input, shape index: {}]   ;;  %s1676_s5 = inlined_call_operand.vmem [shape: bf16[512,2], index: 5, kind: input, shape index: {}]   ;;  %s1677_s6 = inlined_call_operand.vmem [shape: f32[1,1026], index: 6, kind: input, shape index: {}]   ;;  %s1678_s7 = inlined_call_operand.vmem [shape: f32[8,2], index: 7, kind: output, shape index: {}]  }
   0x1   :  { %s26_s25 = sshll.u32 %s1470_s24, 4  ;;  %s1446_s28 = scalar_lea.hbm %s1675_s4, 8192  ;;  %s27_s25 = int_to_ptr.vmem [resolvable:$true] %s26_s25 }
   0x2   :  { %p1447_p0 = scmp.ne.s32.totalorder %s1675_s4, %s1446_s28  ;;  %p1450_p1 = scmp.lt.u32.totalorder %s1446_s28, %s1675_s4 }
   0x4   :  { %p1452_p2 = pnand %p1450_p1, %p1447_p0 }
   0x6   :  { %1455 = shalt.err (!%p1452_p2)
}
   0x7   :  { %s1456_s10 = scalar_lea.vmem %s27_s25, 8192  ;;  %p1461_p4 = scmp.lt.s32.totalorder %s27_s25, %s27_s25 }
   0x8   :  { %p1457_p3 = scmp.ne.s32.totalorder %s27_s25, %s1456_s10  ;;  %p1462_p5 = scmp.lt.s32.totalorder %s1456_s10, %s1456_s10 }
   0xa   :  { %p1463_p6 = por %p1462_p5, %p1461_p4 }
   0xc   :  { %p1464_p7 = pnand %p1463_p6, %p1457_p3 }
   0xe   :  { %1467 = shalt.err (!%p1464_p7)
}
   0xf   :  { %s1471_s11 = smov 128   ;;  %s1472_s12 = smov 8  }
  0x10   :  { %32 = dma.hbm_to_vmem [thread:$0]  %s1675_s4, 8192, %s27_s25, [#allocation3], %s1471_s11, %s1471_s11, %s1472_s12  }
  0x11   :  { %1468 = dma.done.wait [#allocation3], 8192  }
  0x12   :  { %1469 = vsyncadd [#allocation3], 4294959104  ;;  %v1473_v0 = vmov 0   ;;  %v53_v1 = vld [vmem:[%s1674_s3] sm:$0xff]  ;;  %vm69_vm0 = vcmask 1043456   ;;  %v54_v2 = vld [vmem:[%s1674_s3 + $0x8] sm:$0xff] }
  0x13   :  { %114 = vmatprep.mubr.bf16.mxu0 %v1473_v0  ;;  %155 = vmatprep.mubr.bf16.mxu1 %v1473_v0  ;;  %v43_v3 = vld [vmem:[%s1672_s1] sm:$0xff]  ;;  %v1150_v4 = vcombine.high %v53_v1, %v53_v1  ;;  %v1152_v5 = vcombine.high %v54_v2, %v54_v2  ;;  %v1149_v6 = vcombine.low %v53_v1, %v53_v1  ;;  %v1317_v13 = vld [vmem:[%s1673_s2 + $0xc] ss:$16 sps:$4 sm:$0xff]   ;;  %vm65_vm1 = vcmask 64512   ;;  %v1315_v14 = vld [vmem:[%s1673_s2 + $0x8] ss:$16 sps:$4 sm:$0xff]  }
  0x14   :  { %v1151_v7 = vcombine.low %v54_v2, %v54_v2  ;;  %v1314_v8 = vld [vmem:[%s1673_s2 + $0x4] ss:$16 sps:$4 sm:$0xff]   ;;  %v44_v11 = vpack.c.bf16 %v43_v3, %v43_v3  ;;  %v1312_v12 = vld [vmem:[%s1673_s2] ss:$16 sps:$4 sm:$0xff]   ;;  %vm184_vm2 = vcmask 130048   ;;  %vm1142_vm3 = vcmask 15360  }
  0x15   :  { %1153 = vmatprep.subr.msk.bf16.mxu0 %vm69_vm0, %v1150_v4  ;;  %1155 = vmatprep.subr.msk.bf16.mxu1 %vm69_vm0, %v1152_v5  ;;  %v71_v9 = vsel %vm69_vm0, %v1149_v6, 0  ;;  %v1320_v15 = vld [vmem:[#allocation2 + $0x4] ss:$8 sps:$4 sm:$0xff]   ;;  %v1318_v19 = vld [vmem:[#allocation2] ss:$8 sps:$4 sm:$0xff]  }
  0x16   :  { %v77_v10 = vsel %vm69_vm0, %v1151_v7, 0  ;;  %83 = vmatpush1.bf16.msra.mxu0 %v71_v9  ;;  %v1323_v16 = vld [vmem:[#allocation2 + $0x104] ss:$8 sps:$4 sm:$0xff]   ;;  %v1321_v20 = vld [vmem:[#allocation2 + $0x100] ss:$8 sps:$4 sm:$0xff]  }
  0x17   :  { %124 = vmatpush1.bf16.msra.mxu1 %v77_v10  ;;  %188 = vmatprep.subr.bf16.mxu0 %v1314_v8  ;;  %v41_v17 = vld [vmem:[%s1671_s0] sm:$0xff]  ;;  %v1326_v21 = vld [vmem:[#allocation2 + $0x14] ss:$8 sps:$4 sm:$0xff]   ;;  %v1324_v23 = vld [vmem:[#allocation2 + $0x10] ss:$8 sps:$4 sm:$0xff]  }
  0x18   :  { %229 = vmatprep.subr.bf16.mxu1 %v1317_v13  ;;  %v42_v18 = vpack.c.bf16 %v41_v17, %v41_v17  ;;  %v1329_v22 = vld [vmem:[#allocation2 + $0x114] ss:$8 sps:$4 sm:$0xff]   ;;  %v1327_v24 = vld [vmem:[#allocation2 + $0x110] ss:$8 sps:$4 sm:$0xff]   ;;  %v1332_v25 = vld [vmem:[#allocation2 + $0x24] ss:$8 sps:$4 sm:$0xff]  }
  0x19   :  { %1154 = vmatmul.mubr.msk.bf16.vlgmr.msra.gmra.mrb[0].mxu0 %vm65_vm1, %v44_v11  ;;  %v1335_v26 = vld [vmem:[#allocation2 + $0x124] ss:$8 sps:$4 sm:$0xff]   ;;  %v1330_v27 = vld [vmem:[#allocation2 + $0x20] ss:$8 sps:$4 sm:$0xff]   ;;  %v1338_v29 = vld [vmem:[#allocation2 + $0x34] ss:$8 sps:$4 sm:$0xff]  }
  0x1a   :  { %1156 = vmatmul.mubr.msk.bf16.vlgmr.msra.gmra.mrb[0].mxu1 %vm65_vm1, %v44_v11  ;;  %189 = vmatpush1.bf16.msra.mxu0 %v1312_v12  ;;  %v1333_v28 = vld [vmem:[#allocation2 + $0x120] ss:$8 sps:$4 sm:$0xff]   ;;  %v1341_v30 = vld [vmem:[#allocation2 + $0x134] ss:$8 sps:$4 sm:$0xff]   ;;  %v1336_v31 = vld [vmem:[#allocation2 + $0x30] ss:$8 sps:$4 sm:$0xff]  }
  0x1b   :  { %230 = vmatpush1.bf16.msra.mxu1 %v1315_v14  ;;  %220 = vmatprep.mubr.bf16.mxu0 %v1473_v0  ;;  %v1339_v32 = vld [vmem:[#allocation2 + $0x130] ss:$8 sps:$4 sm:$0xff]   ;;  %v1344_v33 = vld [vmem:[#allocation2 + $0x44] ss:$8 sps:$4 sm:$0xff]   ;;  %v1342_v35 = vld [vmem:[#allocation2 + $0x40] ss:$8 sps:$4 sm:$0xff]  }
  0x1c   :  { %261 = vmatprep.mubr.bf16.mxu1 %v1473_v0  ;;  %506 = vmatprep.subr.bf16.mxu0 %v1320_v15  ;;  %v1347_v34 = vld [vmem:[#allocation2 + $0x144] ss:$8 sps:$4 sm:$0xff]   ;;  %v1345_v36 = vld [vmem:[#allocation2 + $0x140] ss:$8 sps:$4 sm:$0xff]   ;;  %v1350_v37 = vld [vmem:[#allocation2 + $0x54] ss:$8 sps:$4 sm:$0xff]  }
  0x1d   :  { %751 = vmatprep.subr.bf16.mxu1 %v1323_v16  ;;  %v1353_v38 = vld [vmem:[#allocation2 + $0x154] ss:$8 sps:$4 sm:$0xff]   ;;  %v1348_v39 = vld [vmem:[#allocation2 + $0x50] ss:$8 sps:$4 sm:$0xff]   ;;  %v1356_v41 = vld [vmem:[#allocation2 + $0x64] ss:$8 sps:$4 sm:$0xff]  }
  0x1e   :  { %v1351_v40 = vld [vmem:[#allocation2 + $0x150] ss:$8 sps:$4 sm:$0xff]   ;;  %v1359_v42 = vld [vmem:[#allocation2 + $0x164] ss:$8 sps:$4 sm:$0xff]   ;;  %v1354_v43 = vld [vmem:[#allocation2 + $0x60] ss:$8 sps:$4 sm:$0xff]  }
  0x1f   :  { %v1357_v44 = vld [vmem:[#allocation2 + $0x160] ss:$8 sps:$4 sm:$0xff]   ;;  %v1362_v45 = vld [vmem:[#allocation2 + $0x74] ss:$8 sps:$4 sm:$0xff]   ;;  %v1360_v47 = vld [vmem:[#allocation2 + $0x70] ss:$8 sps:$4 sm:$0xff]  }
  0x20   :  { %v1365_v46 = vld [vmem:[#allocation2 + $0x174] ss:$8 sps:$4 sm:$0xff]   ;;  %v1363_v48 = vld [vmem:[#allocation2 + $0x170] ss:$8 sps:$4 sm:$0xff]   ;;  %v1368_v49 = vld [vmem:[#allocation2 + $0x84] ss:$8 sps:$4 sm:$0xff]  }
  0x21   :  { %1161 = vmatmul.mubr.msk.bf16.vlgmr.msra.gmra.mrb[4].mxu0 %vm184_vm2, %v42_v18  ;;  %v1371_v50 = vld [vmem:[#allocation2 + $0x184] ss:$8 sps:$4 sm:$0xff]   ;;  %v1366_v51 = vld [vmem:[#allocation2 + $0x80] ss:$8 sps:$4 sm:$0xff]   ;;  %v1374_v53 = vld [vmem:[#allocation2 + $0x94] ss:$8 sps:$4 sm:$0xff]  }
  0x22   :  { %1162 = vmatmul.mubr.msk.bf16.vlgmr.msra.gmra.mrb[4].mxu1 %vm184_vm2, %v42_v18  ;;  %507 = vmatpush1.bf16.msra.mxu0 %v1318_v19  ;;  %v1369_v52 = vld [vmem:[#allocation2 + $0x180] ss:$8 sps:$4 sm:$0xff]   ;;  %v1377_v54 = vld [vmem:[#allocation2 + $0x194] ss:$8 sps:$4 sm:$0xff]   ;;  %v1372_v55 = vld [vmem:[#allocation2 + $0x90] ss:$8 sps:$4 sm:$0xff]   ;;  %v271_v19 = vlaneseq }
  0x23   :  { %752 = vmatpush1.bf16.msra.mxu1 %v1321_v20  ;;  %508 = vmatprep.subr.bf16.mxu0 %v1326_v21  ;;  %v1375_v56 = vld [vmem:[#allocation2 + $0x190] ss:$8 sps:$4 sm:$0xff]   ;;  %v1380_v57 = vld [vmem:[#allocation2 + $0xa4] ss:$8 sps:$4 sm:$0xff]   ;;  %v1378_v59 = vld [vmem:[#allocation2 + $0xa0] ss:$8 sps:$4 sm:$0xff]  }
  0x24   :  { %753 = vmatprep.subr.bf16.mxu1 %v1329_v22  ;;  %v1383_v58 = vld [vmem:[#allocation2 + $0x1a4] ss:$8 sps:$4 sm:$0xff]   ;;  %v1381_v60 = vld [vmem:[#allocation2 + $0x1a0] ss:$8 sps:$4 sm:$0xff]   ;;  %v1386_v61 = vld [vmem:[#allocation2 + $0xb4] ss:$8 sps:$4 sm:$0xff]  }
  0x25   :  { %v1389_v62 = vld [vmem:[#allocation2 + $0x1b4] ss:$8 sps:$4 sm:$0xff]   ;;  %v1384_v63 = vld [vmem:[#allocation2 + $0xb0] ss:$8 sps:$4 sm:$0xff]   ;;  %v1392_v1 = vld [vmem:[#allocation2 + $0xc4] ss:$8 sps:$4 sm:$0xff]  }
  0x26   :  { %509 = vmatpush1.bf16.msra.mxu0 %v1324_v23  ;;  %v1387_v0 = vld [vmem:[#allocation2 + $0x1b0] ss:$8 sps:$4 sm:$0xff]   ;;  %v1395_v2 = vld [vmem:[#allocation2 + $0x1c4] ss:$8 sps:$4 sm:$0xff]   ;;  %v1390_v3 = vld [vmem:[#allocation2 + $0xc0] ss:$8 sps:$4 sm:$0xff]  }
  0x27   :  { %754 = vmatpush1.bf16.msra.mxu1 %v1327_v24  ;;  %510 = vmatprep.subr.bf16.mxu0 %v1332_v25  ;;  %v1393_v4 = vld [vmem:[#allocation2 + $0x1c0] ss:$8 sps:$4 sm:$0xff]   ;;  %v1398_v5 = vld [vmem:[#allocation2 + $0xd4] ss:$8 sps:$4 sm:$0xff]   ;;  %v1396_v6 = vld [vmem:[#allocation2 + $0xd0] ss:$8 sps:$4 sm:$0xff]  }
  0x28   :  { %755 = vmatprep.subr.bf16.mxu1 %v1335_v26  ;;  %v1399_v7 = vld [vmem:[#allocation2 + $0x1d0] ss:$8 sps:$4 sm:$0xff]   ;;  %v1401_v8 = vld [vmem:[#allocation2 + $0x1d4] ss:$8 sps:$4 sm:$0xff]   ;;  %v1404_v9 = vld [vmem:[#allocation2 + $0xe4] ss:$8 sps:$4 sm:$0xff]  }
  0x29   :  { %v1407_v10 = vld [vmem:[#allocation2 + $0x1e4] ss:$8 sps:$4 sm:$0xff]   ;;  %v1402_v11 = vld [vmem:[#allocation2 + $0xe0] ss:$8 sps:$4 sm:$0xff]   ;;  %v1410_v13 = vld [vmem:[#allocation2 + $0xf4] ss:$8 sps:$4 sm:$0xff]  }
  0x2a   :  { %511 = vmatpush1.bf16.msra.mxu0 %v1330_v27  ;;  %v1405_v12 = vld [vmem:[#allocation2 + $0x1e0] ss:$8 sps:$4 sm:$0xff]   ;;  %v1413_v14 = vld [vmem:[#allocation2 + $0x1f4] ss:$8 sps:$4 sm:$0xff]   ;;  %v1408_v15 = vld [vmem:[#allocation2 + $0xf0] ss:$8 sps:$4 sm:$0xff]  }
  0x2b   :  { %756 = vmatpush1.bf16.msra.mxu1 %v1333_v28  ;;  %512 = vmatprep.subr.bf16.mxu0 %v1338_v29  ;;  %v1411_v16 = vld [vmem:[#allocation2 + $0x1f0] ss:$8 sps:$4 sm:$0xff]   ;;  %v1414_v17 = vld [vmem:[%s1676_s5 + $0x40] sm:$0xff]   ;;  %v272_v20 = vshrl.u32 %v271_v19, 7  ;;  %v1437_v19 = vld [vmem:[%s1676_s5 + $0xa8] sm:$0xff]  }
  0x2c   :  { %757 = vmatprep.subr.bf16.mxu1 %v1341_v30  ;;  %v1415_v18 = vld [vmem:[%s1676_s5 + $0xc0] sm:$0xff]  }
  0x2d   :  { %v1556_v29 = vsub.s32 0, %v272_v20  ;;  %v281_v30 = vsub.s32 2, %v272_v20 }
  0x2e   :  { %513 = vmatpush1.bf16.msra.mxu0 %v1336_v31  ;;  %v45_v31 = vld [vmem:[%s1677_s6] sm:$0xf] }
  0x2f   :  { %758 = vmatpush1.bf16.msra.mxu1 %v1339_v32  ;;  %514 = vmatprep.subr.bf16.mxu0 %v1344_v33  ;;  %v1561_v32 = vsub.s32 1, %v272_v20  ;;  %v285_v33 = vsub.s32 3, %v272_v20  ;;  %v1438_v20 = vld [vmem:[%s1676_s5 + $0x70] sm:$0xff]  }
  0x30   :  { %759 = vmatprep.subr.bf16.mxu1 %v1347_v34  ;;  %v274_v34 = vrot.slane %v45_v31, %v1556_v29 }
  0x32   :  { %515 = vmatpush1.bf16.msra.mxu0 %v1342_v35  ;;  %v282_v35 = vrot.slane %v45_v31, %v281_v30  ;;  %v47_v30 = vld [vmem:[%s1677_s6 + $0x6] sm:$0x3] }
  0x33   :  { %760 = vmatpush1.bf16.msra.mxu1 %v1345_v36  ;;  %516 = vmatprep.subr.bf16.mxu0 %v1350_v37 }
  0x34   :  { %761 = vmatprep.subr.bf16.mxu1 %v1353_v38  ;;  %v278_v38 = vrot.slane %v45_v31, %v1561_v32 }
  0x36   :  { %517 = vmatpush1.bf16.msra.mxu0 %v1348_v39  ;;  %v286_v39 = vrot.slane %v45_v31, %v285_v33  ;;  %v584_v33 = vrot.slane %v47_v30, %v1556_v29 }
  0x37   :  { %762 = vmatpush1.bf16.msra.mxu1 %v1351_v40  ;;  %518 = vmatprep.subr.bf16.mxu0 %v1356_v41 }
  0x38   :  { %763 = vmatprep.subr.bf16.mxu1 %v1359_v42 }
  0x3a   :  { %519 = vmatpush1.bf16.msra.mxu0 %v1354_v43 }
  0x3b   :  { %764 = vmatpush1.bf16.msra.mxu1 %v1357_v44  ;;  %520 = vmatprep.subr.bf16.mxu0 %v1362_v45 }
  0x3c   :  { %765 = vmatprep.subr.bf16.mxu1 %v1365_v46 }
  0x3e   :  { %521 = vmatpush1.bf16.msra.mxu0 %v1360_v47 }
  0x3f   :  { %766 = vmatpush1.bf16.msra.mxu1 %v1363_v48  ;;  %522 = vmatprep.subr.bf16.mxu0 %v1368_v49 }
  0x40   :  { %767 = vmatprep.subr.bf16.mxu1 %v1371_v50 }
  0x42   :  { %523 = vmatpush1.bf16.msra.mxu0 %v1366_v51 }
  0x43   :  { %768 = vmatpush1.bf16.msra.mxu1 %v1369_v52  ;;  %524 = vmatprep.subr.bf16.mxu0 %v1374_v53 }
  0x44   :  { %769 = vmatprep.subr.bf16.mxu1 %v1377_v54 }
  0x46   :  { %525 = vmatpush1.bf16.msra.mxu0 %v1372_v55 }
  0x47   :  { %770 = vmatpush1.bf16.msra.mxu1 %v1375_v56  ;;  %526 = vmatprep.subr.bf16.mxu0 %v1380_v57 }
  0x48   :  { %771 = vmatprep.subr.bf16.mxu1 %v1383_v58 }
  0x4a   :  { %527 = vmatpush1.bf16.msra.mxu0 %v1378_v59 }
  0x4b   :  { %772 = vmatpush1.bf16.msra.mxu1 %v1381_v60  ;;  %528 = vmatprep.subr.bf16.mxu0 %v1386_v61  ;;  %v1416_v60 = vld [vmem:[%s1676_s5] sm:$0xff]  }
  0x4c   :  { %773 = vmatprep.subr.bf16.mxu1 %v1389_v62  ;;  %v1417_v61 = vld [vmem:[%s1676_s5 + $0x80] sm:$0xff]  }
  0x4e   :  { %529 = vmatpush1.bf16.msra.mxu0 %v1384_v63 }
  0x4f   :  { %774 = vmatpush1.bf16.msra.mxu1 %v1387_v0  ;;  %530 = vmatprep.subr.bf16.mxu0 %v1392_v1  ;;  %v1418_v0 = vld [vmem:[%s1676_s5 + $0x48] sm:$0xff]  }
  0x50   :  { %775 = vmatprep.subr.bf16.mxu1 %v1395_v2  ;;  %v1419_v1 = vld [vmem:[%s1676_s5 + $0xc8] sm:$0xff]  }
  0x51   :  { %v1420_v2 = vld [vmem:[%s1676_s5 + $0x8] sm:$0xff]  }
  0x52   :  { %531 = vmatpush1.bf16.msra.mxu0 %v1390_v3  ;;  %v1421_v3 = vld [vmem:[%s1676_s5 + $0x88] sm:$0xff]  }
  0x53   :  { %776 = vmatpush1.bf16.msra.mxu1 %v1393_v4  ;;  %532 = vmatprep.subr.bf16.mxu0 %v1398_v5  ;;  %v1422_v4 = vld [vmem:[%s1676_s5 + $0x50] sm:$0xff]  }
  0x54   :  { %777 = vmatprep.subr.bf16.mxu1 %v1401_v8  ;;  %v1423_v5 = vld [vmem:[%s1676_s5 + $0xd0] sm:$0xff]   ;;  %v1426_v8 = vld [vmem:[%s1676_s5 + $0x58] sm:$0xff]  }
  0x56   :  { %533 = vmatpush1.bf16.msra.mxu0 %v1396_v6  ;;  %v1424_v6 = vld [vmem:[%s1676_s5 + $0x10] sm:$0xff]  }
  0x57   :  { %778 = vmatpush1.bf16.msra.mxu1 %v1399_v7  ;;  %534 = vmatprep.subr.bf16.mxu0 %v1404_v9  ;;  %v1425_v7 = vld [vmem:[%s1676_s5 + $0x90] sm:$0xff]   ;;  %v1427_v9 = vld [vmem:[%s1676_s5 + $0xd8] sm:$0xff]  }
  0x58   :  { %779 = vmatprep.subr.bf16.mxu1 %v1407_v10  ;;  %v1428_v10 = vld [vmem:[%s1676_s5 + $0x18] sm:$0xff]  }
  0x5a   :  { %535 = vmatpush1.bf16.msra.mxu0 %v1402_v11  ;;  %v1429_v11 = vld [vmem:[%s1676_s5 + $0x98] sm:$0xff]  }
  0x5b   :  { %780 = vmatpush1.bf16.msra.mxu1 %v1405_v12  ;;  %536 = vmatprep.subr.bf16.mxu0 %v1410_v13  ;;  %v1430_v12 = vld [vmem:[%s1676_s5 + $0x60] sm:$0xff]  }
  0x5c   :  { %781 = vmatprep.subr.bf16.mxu1 %v1413_v14  ;;  %v1431_v13 = vld [vmem:[%s1676_s5 + $0xe0] sm:$0xff]  }
  0x5d   :  { %v1432_v14 = vld [vmem:[%s1676_s5 + $0x20] sm:$0xff]  }
  0x5e   :  { %537 = vmatpush1.bf16.msra.mxu0 %v1408_v15  ;;  %v1433_v15 = vld [vmem:[%s1676_s5 + $0xa0] sm:$0xff]  }
  0x5f   :  { %782 = vmatpush1.bf16.msra.mxu1 %v1411_v16  ;;  %1260 = vmatprep.subr.bf16.mxu0 %v1414_v17  ;;  %v1434_v16 = vld [vmem:[%s1676_s5 + $0x68] sm:$0xff]  }
  0x60   :  { %1282 = vmatprep.subr.bf16.mxu1 %v1415_v18  ;;  %v1435_v17 = vld [vmem:[%s1676_s5 + $0xe8] sm:$0xff]  }
  0x61   :  { %v1436_v18 = vld [vmem:[%s1676_s5 + $0x28] sm:$0xff]  }
  0xec   :  { %v116_v21 = vpop.f32.mrb[0].mxu0 }
  0xed   :  { %v157_v22 = vpop.f32.mrb[0].mxu1  ;;  %v118_v23 = vpop.f32.mrb[1].mxu0 }
  0xee   :  { %v159_v24 = vpop.f32.mrb[1].mxu1  ;;  %v120_v25 = vpop.f32.mrb[2].mxu0 }
  0xef   :  { %v161_v26 = vpop.f32.mrb[2].mxu1  ;;  %v121_v27 = vpop.f32.mrb[3].mxu0  ;;  %v1443_v25 = vld [vmem:[%s1676_s5 + $0xf8] sm:$0xff]  }
  0xf0   :  { %v162_v28 = vpop.f32.mrb[3].mxu1  ;;  %v1444_v26 = vld [vmem:[%s1676_s5 + $0x38] sm:$0xff]  }
  0xf1   :  { %v1445_v27 = vld [vmem:[%s1676_s5 + $0xb8] sm:$0xff]   ;;  %v46_v28 = vld [vmem:[%s1677_s6 + $0x4] sm:$0x3] }
  0xf2   :  { %v339_v31 = vrot.slane %v46_v28, %v1556_v29 }
  0xf4   :  { %v222_v36 = vpop.f32.mrb[4].mxu0 }
  0xf5   :  { %v263_v37 = vpop.f32.mrb[4].mxu1  ;;  %v223_v40 = vadd.f32 %v222_v36, %v116_v21  ;;  %v224_v42 = vpop.f32.mrb[5].mxu0  ;;  %v1439_v21 = vld [vmem:[%s1676_s5 + $0xf0] sm:$0xff]  }
  0xf6   :  { %v264_v41 = vadd.f32 %v263_v37, %v157_v22  ;;  %v265_v43 = vpop.f32.mrb[5].mxu1  ;;  %v225_v44 = vadd.f32 %v224_v42, %v118_v23  ;;  %v226_v46 = vpop.f32.mrb[6].mxu0  ;;  %v1440_v22 = vld [vmem:[%s1676_s5 + $0x30] sm:$0xff]  }
  0xf7   :  { %v266_v45 = vadd.f32 %v265_v43, %v159_v24  ;;  %v267_v47 = vpop.f32.mrb[6].mxu1  ;;  %v291_v48 = vadd.f32 %v274_v34, %v223_v40  ;;  %v227_v50 = vpop.f32.mrb[7].mxu0  ;;  %v1441_v23 = vld [vmem:[%s1676_s5 + $0xb0] sm:$0xff]   ;;  %v1442_v24 = vld [vmem:[%s1676_s5 + $0x78] sm:$0xff]   ;;  %v343_v34 = vrot.slane %v46_v28, %v1561_v32 }
  0xf8   :  { %v293_v49 = vadd.f32 %v282_v35, %v264_v41  ;;  %v268_v51 = vpop.f32.mrb[7].mxu1  ;;  %v292_v52 = vadd.f32 %v278_v38, %v225_v44  ;;  %v588_v35 = vrot.slane %v47_v30, %v1561_v32 }
  0xf9   :  { %v294_v53 = vadd.f32 %v286_v39, %v266_v45  ;;  %v295_v54 = vmax.f32 %v291_v48, 0.0 }
  0xfa   :  { %v297_v55 = vmax.f32 %v293_v49, 0.0  ;;  %v296_v56 = vmax.f32 %v292_v52, 0.0 }
  0xfb   :  { %v298_v57 = vmax.f32 %v294_v53, 0.0  ;;  %v299_v62 = vpack.c.bf16 %v295_v54, %v295_v54 }
  0xfc   :  { %v300_v58 = vpack.c.bf16 %v296_v56, %v296_v56  ;;  %v301_v63 = vpack.c.bf16 %v297_v55, %v297_v55  ;;  %v1227_v56 = vld [vmem:[%s1677_s6 + $0x8] ss:$0 sm:$0xff] }
  0xfd   :  { %v302_v59 = vpack.c.bf16 %v298_v57, %v298_v57 }
  0xfe   :  { %538 = vmatprep.mubr.bf16.mxu0 %v300_v58 }
  0xff   :  { %783 = vmatprep.mubr.bf16.mxu1 %v302_v59  ;;  %539 = vmatmul.mubr.bf16.vlgmr.msra.gmra.mrb[8].mxu0 %v299_v62 }
 0x100   :  { %784 = vmatmul.mubr.bf16.vlgmr.msra.gmra.mrb[8].mxu1 %v301_v63  ;;  %1261 = vmatpush3.bf16.msra.mxu0 %v1416_v60 }
 0x101   :  { %1283 = vmatpush3.bf16.msra.mxu1 %v1417_v61  ;;  %1262 = vmatprep.subr.bf16.mxu0 %v1418_v0 }
 0x102   :  { %1284 = vmatprep.subr.bf16.mxu1 %v1419_v1 }
 0x104   :  { %1263 = vmatpush3.bf16.msra.mxu0 %v1420_v2 }
 0x105   :  { %1285 = vmatpush3.bf16.msra.mxu1 %v1421_v3  ;;  %1264 = vmatprep.subr.bf16.mxu0 %v1422_v4 }
 0x106   :  { %1286 = vmatprep.subr.bf16.mxu1 %v1423_v5 }
 0x108   :  { %1265 = vmatpush3.bf16.msra.mxu0 %v1424_v6 }
 0x109   :  { %1287 = vmatpush3.bf16.msra.mxu1 %v1425_v7  ;;  %1266 = vmatprep.subr.bf16.mxu0 %v1426_v8 }
 0x10a   :  { %1288 = vmatprep.subr.bf16.mxu1 %v1427_v9 }
 0x10c   :  { %1267 = vmatpush3.bf16.msra.mxu0 %v1428_v10 }
 0x10d   :  { %1289 = vmatpush3.bf16.msra.mxu1 %v1429_v11  ;;  %1268 = vmatprep.subr.bf16.mxu0 %v1430_v12 }
 0x10e   :  { %1290 = vmatprep.subr.bf16.mxu1 %v1431_v13 }
 0x110   :  { %1269 = vmatpush3.bf16.msra.mxu0 %v1432_v14 }
 0x111   :  { %1291 = vmatpush3.bf16.msra.mxu1 %v1433_v15  ;;  %1270 = vmatprep.subr.bf16.mxu0 %v1434_v16 }
 0x112   :  { %1292 = vmatprep.subr.bf16.mxu1 %v1435_v17 }
 0x114   :  { %1271 = vmatpush3.bf16.msra.mxu0 %v1436_v18 }
 0x115   :  { %1293 = vmatpush3.bf16.msra.mxu1 %v1437_v19  ;;  %1272 = vmatprep.subr.bf16.mxu0 %v1438_v20 }
 0x116   :  { %1294 = vmatprep.subr.bf16.mxu1 %v1439_v21 }
 0x118   :  { %1273 = vmatpush3.bf16.msra.mxu0 %v1440_v22 }
 0x119   :  { %1295 = vmatpush3.bf16.msra.mxu1 %v1441_v23  ;;  %1274 = vmatprep.subr.bf16.mxu0 %v1442_v24 }
 0x11a   :  { %1296 = vmatprep.subr.bf16.mxu1 %v1443_v25 }
 0x11c   :  { %1275 = vmatpush3.bf16.msra.mxu0 %v1444_v26 }
 0x11d   :  { %1297 = vmatpush3.bf16.msra.mxu1 %v1445_v27 }
 0x1d2   :  { %v540_v36 = vpop.f32.mrb[8].mxu0 }
 0x1d3   :  { %v785_v37 = vpop.f32.mrb[8].mxu1  ;;  %v541_v38 = vadd.f32 %v540_v36, %v339_v31  ;;  %v542_v40 = vpop.f32.mrb[9].mxu0 }
 0x1d4   :  { %v786_v39 = vadd.f32 %v785_v37, %v584_v33  ;;  %v787_v41 = vpop.f32.mrb[9].mxu1  ;;  %v543_v42 = vadd.f32 %v542_v40, %v343_v34  ;;  %v544_v44 = vpop.f32.mrb[10].mxu0 }
 0x1d5   :  { %v788_v43 = vadd.f32 %v787_v41, %v588_v35  ;;  %v789_v45 = vpop.f32.mrb[10].mxu1  ;;  %v792_v46 = vmax.f32 %v541_v38, 0.0  ;;  %v545_v48 = vpop.f32.mrb[11].mxu0 }
 0x1d6   :  { %v794_v47 = vmax.f32 %v786_v39, 0.0  ;;  %v790_v49 = vpop.f32.mrb[11].mxu1  ;;  %v793_v50 = vmax.f32 %v543_v42, 0.0 }
 0x1d7   :  { %v795_v29 = vmax.f32 %v788_v43, 0.0  ;;  %v796_v53 = vpack.c.bf16 %v792_v46, %v792_v46 }
 0x1d8   :  { %v797_v51 = vpack.c.bf16 %v793_v50, %v793_v50  ;;  %v798_v32 = vpack.c.bf16 %v794_v47, %v794_v47 }
 0x1d9   :  { %v799_v52 = vpack.c.bf16 %v795_v29, %v795_v29 }
 0x1da   :  { %1094 = vmatprep.mubr.bf16.mxu0 %v797_v51 }
 0x1db   :  { %1134 = vmatprep.mubr.bf16.mxu1 %v799_v52  ;;  %1095 = vmatmul.mubr.bf16.vlgmr.msra.gmra.mrb[12].mxu0 %v796_v53 }
 0x1dc   :  { %1135 = vmatmul.mubr.bf16.vlgmr.msra.gmra.mrb[12].mxu1 %v798_v32 }
 0x2ae   :  { %v1276_v54 = vpop.f32.mrb[12].mxu0 }
 0x2af   :  { %v1298_v55 = vpop.f32.mrb[12].mxu1  ;;  %v1277_v57 = vpop.f32.mrb[13].mxu0 }
 0x2b0   :  { %v1299_v58 = vpop.f32.mrb[13].mxu1  ;;  %v1278_v59 = vadd.f32 %v1277_v57, %v1276_v54  ;;  %v1279_v61 = vpop.f32.mrb[14].mxu0 }
 0x2b1   :  { %v1300_v60 = vadd.f32 %v1299_v58, %v1298_v55  ;;  %v1301_v62 = vpop.f32.mrb[14].mxu1  ;;  %v1280_v63 = vpop.f32.mrb[15].mxu0 }
 0x2b2   :  { %v1302_v0 = vpop.f32.mrb[15].mxu1  ;;  %v1097_v1 = vadd.f32 %v1278_v59, %v1227_v56 }
 0x2b4   :  { %v1137_v2 = vadd.f32 %v1300_v60, %v1097_v1 }
 0x2b6   :  { %1143 = vst.msk [vmem:[%s1678_s7] sm:$0xff] %vm1142_vm3, %v1137_v2 }
 0x2b7   :  { %1148 = vsyncpa [#allocation3], 1 }

</bundles_post_ra>
